<compile_context>
chip_gen: v7x
topology: tpu7x:2x2x1
jax: 0.10.0
libtpu: 0.0.40
codegen_flags: <defaults>
</compile_context>

<pallas_src>
import math

import jax
import jax.numpy as jnp
from jax.experimental import pallas as pl
from jax.experimental.pallas import tpu as pltpu


_TARGET_INFLIGHT = 8          # aim for ~8 concurrent DMAs (v7x guidance)
_MIN_CHUNK_BYTES = 128 * 1024 # don't create tiny chunk descriptors (v5e/v6e)
_MAX_SEMS = 8                 # cap on outstanding copies / DMA semaphores


def _sublane_multiple(dtype):
    itemsize = jnp.dtype(dtype).itemsize
    return max(8, 32 // max(1, itemsize))  # f32 -> 8, bf16 -> 16, int8/fp8 -> 32


def _padded_slab_elems(s1, s2, sub):
    return ((s1 + sub - 1) // sub) * sub * ((s2 + 127) // 128) * 128


def _best_trailing_factorization(h, w, dtype):
    """Pick (S1, S2) with S1*S2 == h*w minimizing (sublane,128)-tile padding.

    Returns (h, w) unchanged unless a factorization is strictly better, so we
    never pay a relayout for zero gain.
    """
    p = h * w
    sub = _sublane_multiple(dtype)
    orig_cost = _padded_slab_elems(h, w, sub)
    best, best_cost = None, None
    d = 1
    while d * d <= p:
        if p % d == 0:
            for s2 in {d, p // d}:
                s1 = p // s2
                cost = _padded_slab_elems(s1, s2, sub)
                if (best is None or cost < best_cost
                        or (cost == best_cost and s2 > best[1])):
                    best, best_cost = (s1, s2), cost
        d += 1
    if best is None or best_cost >= orig_cost:
        return (h, w)
    return best


def _build_copy_plan(live_starts, live_sizes, nb, slab_elems, itemsize):
    """Static list of (segment, ch_start, ch_size, batch_off, batch_len) copies
    issued by each grid step (batch offsets relative to the step's base row)."""
    n_seg = len(live_sizes)
    plan = []
    for seg, (start, size) in enumerate(zip(live_starts, live_sizes)):
        seg_bytes = nb * size * slab_elems * itemsize
        chunks = min(nb, max(1, _TARGET_INFLIGHT // max(1, n_seg)))
        while chunks > 1 and seg_bytes // chunks < _MIN_CHUNK_BYTES:
            chunks -= 1
        base, rem = divmod(nb, chunks)
        b_off = 0
        for c in range(chunks):
            b_len = base + (1 if c < rem else 0)
            if b_len == 0:
                continue
            plan.append((seg, start, size, b_off, b_len))
            b_off += b_len
    return plan


def _make_split_kernel(copy_plan, n_seg, nb, grid_size, max_sems):
    """Kernel issuing one strided HBM->HBM DMA per planned copy, with a sliding
    window of at most `max_sems` outstanding copies (semaphores reused safely)."""

    def kernel(x_ref, *refs):
        out_refs = refs[:n_seg]
        sems = refs[n_seg]
        n_base = pl.program_id(0) * nb if grid_size > 1 else 0
        copies = []
        for j, (seg, ch_start, ch_size, b_off, b_len) in enumerate(copy_plan):
            if j >= max_sems:                 # bound outstanding DMAs before
                copies[j - max_sems].wait()   # reusing its semaphore slot
            row0 = n_base + b_off if grid_size > 1 else b_off
            cp = pltpu.make_async_copy(
                x_ref.at[pl.ds(row0, b_len), pl.ds(ch_start, ch_size), :, :],
                out_refs[seg].at[pl.ds(row0, b_len), :, :, :],
                sems.at[j % max_sems],
            )
            cp.start()
            copies.append(cp)
        for j in range(max(0, len(copies) - max_sems), len(copies)):
            copies[j].wait()

    return kernel


def split_pallas(x, indices, *, use_pallas=True):
    """Pallas equivalent of Split(indices).forward(x) for (N, C, ...) x."""
    if x.ndim < 2:
        raise ValueError("split_pallas expects at least a (N, C, ...) array")
    N, C = x.shape[0], x.shape[1]
    rest = x.shape[2:]

    # Validate split indices (static Python ints, non-negative, sum <= C).
    starts, sizes = [], []
    s = 0
    for idx in indices:
        idx = int(idx)
        if idx < 0:
            raise ValueError(f"negative split index: {idx}")
        starts.append(s)
        sizes.append(idx)
        s += idx
    if s > C:
        raise ValueError(f"split indices sum to {s} > {C} channels")
    starts.append(s)
    sizes.append(C - s)

    P = math.prod(rest) if rest else 1

    # Non-Pallas fast path: plain slices let XLA fuse the split into consumers
    # (beats any copy kernel when materialization isn't required).  Also used
    # for degenerate shapes where a DMA kernel brings nothing.
    if (not use_pallas) or N == 0 or P == 0 or x.ndim < 3:
        outs = []
        remain = x
        for idx in sizes[:-1]:
            outs.append(remain[:, :idx, ...])
            remain = remain[:, idx:, ...]
        outs.append(remain)
        return outs

    # Lane-dense re-factorization of the trailing (spatial) dims: keep the
    # channel axis 3rd-from-last, make the last two dims (8,128)-tile friendly.
    h_like = rest[0]
    w_like = math.prod(rest[1:]) if len(rest) >= 2 else 1
    S1, S2 = _best_trailing_factorization(h_like, w_like, x.dtype)
    x_r = x.reshape(N, C, S1, S2)

    # Only non-empty segments go through the kernel; size-0 segments are
    # emitted directly as empty arrays.
    live = [(i, st, sz) for i, (st, sz) in enumerate(zip(starts, sizes)) if sz > 0]

    outs_live = ()
    if live:
        live_starts = [st for _, st, _ in live]
        live_sizes = [sz for _, _, sz in live]
        itemsize = jnp.dtype(x.dtype).itemsize
        moved_bytes = sum(N * sz * P * itemsize for sz in live_sizes)

        # Grid over batch halves: both v7x TensorCores issue their own DMAs
        # ("parallel"); on single-TC chips it's two cheap sequential steps.
        G = 2 if (N >= 2 and N % 2 == 0) else 1
        nb = N // G

        copy_plan = _build_copy_plan(live_starts, live_sizes, nb, P, itemsize)
        max_sems = min(len(copy_plan), _MAX_SEMS)
        kernel = _make_split_kernel(copy_plan, len(live_sizes), nb, G, max_sems)

        grid_spec = pltpu.PrefetchScalarGridSpec(
            num_scalar_prefetch=0,
            grid=(G,),
            in_specs=[pl.BlockSpec(memory_space=pl.ANY)],
            out_specs=tuple(pl.BlockSpec(memory_space=pl.ANY)
                            for _ in live_sizes),
            scratch_shapes=[pltpu.SemaphoreType.DMA((max_sems,))],
        )
        outs_live = pl.pallas_call(
            kernel,
            out_shape=tuple(jax.ShapeDtypeStruct((N, sz, S1, S2), x.dtype)
                            for sz in live_sizes),
            grid_spec=grid_spec,
            compiler_params=pltpu.CompilerParams(
                dimension_semantics=("parallel",)),
            cost_estimate=pl.CostEstimate(
                flops=0, transcendentals=0,
                bytes_accessed=2 * moved_bytes),  # read + write
        )(x_r)

    # Reassemble outputs in original order, reshape back, insert empties.
    outs = []
    it = iter(outs_live)
    for sz in sizes:
        if sz == 0:
            outs.append(jnp.zeros((N, sz) + rest, x.dtype))
        else:
            outs.append(next(it).reshape((N, sz) + rest))
    return outs


if __name__ == "__main__":
    key = jax.random.PRNGKey(0)
    N, C, H, W = 2, 4, 16, 16
    x = jax.random.normal(key, (N, C, H, W), dtype=jnp.float32)

    def reference_split(x, indices):
        ref = []
        remain = x
        for idx in indices:
            ref.append(remain[:, :idx, ...])
            remain = remain[:, idx:, ...]
        ref.append(remain)
        return ref

    def check(x, indices):
        outs = split_pallas(x, indices)
        outs = [jax.block_until_ready(o) for o in outs]
        ref = reference_split(x, indices)
        assert len(outs) == len(ref)
        for o, r in zip(outs, ref):
            assert o.shape == r.shape, (o.shape, r.shape)
            assert o.dtype == r.dtype, (o.dtype, r.dtype)
            assert jnp.array_equal(o, r), "mismatch vs reference slicing"

    # Main case: lane-dense reshape path ((16,16) -> (2,128)), 3 segments.
    check(x, [1, 2])
    # Zero-size trailing remainder (handled outside the kernel).
    check(x, [2, 2])
    # Already tile-friendly trailing dims: no reshape, 2 segments.
    x2 = jax.random.normal(jax.random.PRNGKey(0), (2, 3, 8, 128),
                           dtype=jnp.float32)
    check(x2, [1])

    print("KERNEL_OK")
</pallas_src>

<mosaic_0001>
module attributes {stable_mosaic.version = 11 : i64} {
  func.func @kernel(%arg0: i32, %arg1: memref<2x4x2x128xf32, #tpu.memory_space<any>>, %arg2: memref<2x1x2x128xf32, #tpu.memory_space<any>>, %arg3: memref<2x2x2x128xf32, #tpu.memory_space<any>>, %arg4: memref<2x1x2x128xf32, #tpu.memory_space<any>>, %arg5: memref<3x!tpu.dma_semaphore, #tpu.memory_space<semaphore_mem>>) attributes {dimension_semantics = [#tpu.dimension_semantics<parallel>], iteration_bounds = array<i64: 2>, scalar_prefetch = 0 : i64, scratch_operands = 1 : i64, tpu.core_type = #tpu.core_type<tc>, window_params = [{}, {}, {}, {}]} {
    %c1_i32 = arith.constant 1 : i32
    %0 = arith.muli %arg0, %c1_i32 : i32
    %c0_i32 = arith.constant 0 : i32
    %1 = arith.addi %0, %c0_i32 : i32
    %c0_i32_0 = arith.constant 0 : i32
    %c0_i32_1 = arith.constant 0 : i32
    %c0_i32_2 = arith.constant 0 : i32
    %c0_i32_3 = arith.constant 0 : i32
    %2 = tpu.memref_slice %arg1[%1, %c0_i32_1, %c0_i32_2, %c0_i32_3] : memref<2x4x2x128xf32, #tpu.memory_space<any>> -> memref<1x1x2x128xf32, #tpu.memory_space<any>>
    %c0_i32_4 = arith.constant 0 : i32
    %c0_i32_5 = arith.constant 0 : i32
    %c0_i32_6 = arith.constant 0 : i32
    %3 = tpu.memref_slice %arg2[%1, %c0_i32_4, %c0_i32_5, %c0_i32_6] : memref<2x1x2x128xf32, #tpu.memory_space<any>> -> memref<1x1x2x128xf32, #tpu.memory_space<any>>
    %4 = tpu.memref_slice %arg5[%c0_i32_0] : memref<3x!tpu.dma_semaphore, #tpu.memory_space<semaphore_mem>> -> memref<1x!tpu.dma_semaphore, #tpu.memory_space<semaphore_mem>>
    %5 = tpu.memref_squeeze %4 : memref<1x!tpu.dma_semaphore, #tpu.memory_space<semaphore_mem>> -> memref<!tpu.dma_semaphore, #tpu.memory_space<semaphore_mem>>
    tpu.enqueue_dma source(%2 : memref<1x1x2x128xf32, #tpu.memory_space<any>>) target(%3 : memref<1x1x2x128xf32, #tpu.memory_space<any>>) target_semaphore(%5 : memref<!tpu.dma_semaphore, #tpu.memory_space<semaphore_mem>>)
    %c0_i32_7 = arith.constant 0 : i32
    %6 = arith.addi %0, %c0_i32_7 : i32
    %c1_i32_8 = arith.constant 1 : i32
    %c1_i32_9 = arith.constant 1 : i32
    %c0_i32_10 = arith.constant 0 : i32
    %c0_i32_11 = arith.constant 0 : i32
    %7 = tpu.memref_slice %arg1[%6, %c1_i32_9, %c0_i32_10, %c0_i32_11] : memref<2x4x2x128xf32, #tpu.memory_space<any>> -> memref<1x2x2x128xf32, #tpu.memory_space<any>>
    %c0_i32_12 = arith.constant 0 : i32
    %c0_i32_13 = arith.constant 0 : i32
    %c0_i32_14 = arith.constant 0 : i32
    %8 = tpu.memref_slice %arg3[%6, %c0_i32_12, %c0_i32_13, %c0_i32_14] : memref<2x2x2x128xf32, #tpu.memory_space<any>> -> memref<1x2x2x128xf32, #tpu.memory_space<any>>
    %9 = tpu.memref_slice %arg5[%c1_i32_8] : memref<3x!tpu.dma_semaphore, #tpu.memory_space<semaphore_mem>> -> memref<1x!tpu.dma_semaphore, #tpu.memory_space<semaphore_mem>>
    %10 = tpu.memref_squeeze %9 : memref<1x!tpu.dma_semaphore, #tpu.memory_space<semaphore_mem>> -> memref<!tpu.dma_semaphore, #tpu.memory_space<semaphore_mem>>
    tpu.enqueue_dma source(%7 : memref<1x2x2x128xf32, #tpu.memory_space<any>>) target(%8 : memref<1x2x2x128xf32, #tpu.memory_space<any>>) target_semaphore(%10 : memref<!tpu.dma_semaphore, #tpu.memory_space<semaphore_mem>>)
    %c0_i32_15 = arith.constant 0 : i32
    %11 = arith.addi %0, %c0_i32_15 : i32
    %c2_i32 = arith.constant 2 : i32
    %c3_i32 = arith.constant 3 : i32
    %c0_i32_16 = arith.constant 0 : i32
    %c0_i32_17 = arith.constant 0 : i32
    %12 = tpu.memref_slice %arg1[%11, %c3_i32, %c0_i32_16, %c0_i32_17] : memref<2x4x2x128xf32, #tpu.memory_space<any>> -> memref<1x1x2x128xf32, #tpu.memory_space<any>>
    %c0_i32_18 = arith.constant 0 : i32
    %c0_i32_19 = arith.constant 0 : i32
    %c0_i32_20 = arith.constant 0 : i32
    %13 = tpu.memref_slice %arg4[%11, %c0_i32_18, %c0_i32_19, %c0_i32_20] : memref<2x1x2x128xf32, #tpu.memory_space<any>> -> memref<1x1x2x128xf32, #tpu.memory_space<any>>
    %14 = tpu.memref_slice %arg5[%c2_i32] : memref<3x!tpu.dma_semaphore, #tpu.memory_space<semaphore_mem>> -> memref<1x!tpu.dma_semaphore, #tpu.memory_space<semaphore_mem>>
    %15 = tpu.memref_squeeze %14 : memref<1x!tpu.dma_semaphore, #tpu.memory_space<semaphore_mem>> -> memref<!tpu.dma_semaphore, #tpu.memory_space<semaphore_mem>>
    tpu.enqueue_dma source(%12 : memref<1x1x2x128xf32, #tpu.memory_space<any>>) target(%13 : memref<1x1x2x128xf32, #tpu.memory_space<any>>) target_semaphore(%15 : memref<!tpu.dma_semaphore, #tpu.memory_space<semaphore_mem>>)
    %c0_i32_21 = arith.constant 0 : i32
    %c0_i32_22 = arith.constant 0 : i32
    %c0_i32_23 = arith.constant 0 : i32
    %c0_i32_24 = arith.constant 0 : i32
    %16 = tpu.memref_slice %arg1[%1, %c0_i32_22, %c0_i32_23, %c0_i32_24] : memref<2x4x2x128xf32, #tpu.memory_space<any>> -> memref<1x1x2x128xf32, #tpu.memory_space<any>>
    %c0_i32_25 = arith.constant 0 : i32
    %c0_i32_26 = arith.constant 0 : i32
    %c0_i32_27 = arith.constant 0 : i32
    %17 = tpu.memref_slice %arg2[%1, %c0_i32_25, %c0_i32_26, %c0_i32_27] : memref<2x1x2x128xf32, #tpu.memory_space<any>> -> memref<1x1x2x128xf32, #tpu.memory_space<any>>
    %18 = tpu.memref_slice %arg5[%c0_i32_21] : memref<3x!tpu.dma_semaphore, #tpu.memory_space<semaphore_mem>> -> memref<1x!tpu.dma_semaphore, #tpu.memory_space<semaphore_mem>>
    %19 = tpu.memref_squeeze %18 : memref<1x!tpu.dma_semaphore, #tpu.memory_space<semaphore_mem>> -> memref<!tpu.dma_semaphore, #tpu.memory_space<semaphore_mem>>
    tpu.wait_dma2 semaphore(%19 : memref<!tpu.dma_semaphore, #tpu.memory_space<semaphore_mem>>) src(%16 : memref<1x1x2x128xf32, #tpu.memory_space<any>>) dst(%17 : memref<1x1x2x128xf32, #tpu.memory_space<any>>)
    %c1_i32_28 = arith.constant 1 : i32
    %c1_i32_29 = arith.constant 1 : i32
    %c0_i32_30 = arith.constant 0 : i32
    %c0_i32_31 = arith.constant 0 : i32
    %20 = tpu.memref_slice %arg1[%6, %c1_i32_29, %c0_i32_30, %c0_i32_31] : memref<2x4x2x128xf32, #tpu.memory_space<any>> -> memref<1x2x2x128xf32, #tpu.memory_space<any>>
    %c0_i32_32 = arith.constant 0 : i32
    %c0_i32_33 = arith.constant 0 : i32
    %c0_i32_34 = arith.constant 0 : i32
    %21 = tpu.memref_slice %arg3[%6, %c0_i32_32, %c0_i32_33, %c0_i32_34] : memref<2x2x2x128xf32, #tpu.memory_space<any>> -> memref<1x2x2x128xf32, #tpu.memory_space<any>>
    %22 = tpu.memref_slice %arg5[%c1_i32_28] : memref<3x!tpu.dma_semaphore, #tpu.memory_space<semaphore_mem>> -> memref<1x!tpu.dma_semaphore, #tpu.memory_space<semaphore_mem>>
    %23 = tpu.memref_squeeze %22 : memref<1x!tpu.dma_semaphore, #tpu.memory_space<semaphore_mem>> -> memref<!tpu.dma_semaphore, #tpu.memory_space<semaphore_mem>>
    tpu.wait_dma2 semaphore(%23 : memref<!tpu.dma_semaphore, #tpu.memory_space<semaphore_mem>>) src(%20 : memref<1x2x2x128xf32, #tpu.memory_space<any>>) dst(%21 : memref<1x2x2x128xf32, #tpu.memory_space<any>>)
    %c2_i32_35 = arith.constant 2 : i32
    %c3_i32_36 = arith.constant 3 : i32
    %c0_i32_37 = arith.constant 0 : i32
    %c0_i32_38 = arith.constant 0 : i32
    %24 = tpu.memref_slice %arg1[%11, %c3_i32_36, %c0_i32_37, %c0_i32_38] : memref<2x4x2x128xf32, #tpu.memory_space<any>> -> memref<1x1x2x128xf32, #tpu.memory_space<any>>
    %c0_i32_39 = arith.constant 0 : i32
    %c0_i32_40 = arith.constant 0 : i32
    %c0_i32_41 = arith.constant 0 : i32
    %25 = tpu.memref_slice %arg4[%11, %c0_i32_39, %c0_i32_40, %c0_i32_41] : memref<2x1x2x128xf32, #tpu.memory_space<any>> -> memref<1x1x2x128xf32, #tpu.memory_space<any>>
    %26 = tpu.memref_slice %arg5[%c2_i32_35] : memref<3x!tpu.dma_semaphore, #tpu.memory_space<semaphore_mem>> -> memref<1x!tpu.dma_semaphore, #tpu.memory_space<semaphore_mem>>
    %27 = tpu.memref_squeeze %26 : memref<1x!tpu.dma_semaphore, #tpu.memory_space<semaphore_mem>> -> memref<!tpu.dma_semaphore, #tpu.memory_space<semaphore_mem>>
    tpu.wait_dma2 semaphore(%27 : memref<!tpu.dma_semaphore, #tpu.memory_space<semaphore_mem>>) src(%24 : memref<1x1x2x128xf32, #tpu.memory_space<any>>) dst(%25 : memref<1x1x2x128xf32, #tpu.memory_space<any>>)
    return
  }
}

</mosaic_0001>

<bundles_post_ra>
// kernel: tpu_custom_call.1
= control target key start
LH: loop header
LB: loop body
LE: loop exit
PB: predicated region body
PF: predicated region fallthrough
CT: control target
= control target key end

     0   :  { %s203_s12 = smov 0   ;;  %s220_s0 = inlined_call_operand.hbm [shape: f32[2,4,2,128], index: 0, kind: input, shape index: {}]   ;;  %s221_s1 = inlined_call_operand.hbm [shape: f32[2,1,2,128], index: 1, kind: output, shape index: {0}]   ;;  %s222_s2 = inlined_call_operand.hbm [shape: f32[2,2,2,128], index: 2, kind: output, shape index: {1}]   ;;  %s223_s3 = inlined_call_operand.hbm [shape: f32[2,1,2,128], index: 3, kind: output, shape index: {2}]  }
   0x1 LB: > { %s141_s13 = sshll.u32 %s174_s12, 7  ;;  %s142_s14 = sshll.u32 %s174_s12, 5  ;;  %s174_s12 = sphi %s203_s12, %s14_s12  }
   0x2   : > { %s18_s17 = scalar_lea.hbm %s220_s0, %s141_s13  ;;  %s21_s20 = scalar_lea.hbm %s221_s1, %s142_s14 }
   0x3   : > { %s113_s21 = scalar_lea.hbm %s18_s17, 32  ;;  %s176_s22 = smov [#allocation2]  }
   0x4   : > { %s177_s23 = smov [#allocation3]   ;;  %s178_s24 = smov 0  }
   0x5   : > { %34 = dma.general %s18_s17, 32, %s21_s20, %s176_s22, %s177_s23, [#allocation4], %s178_s24, 0  }
   0x6   : > { %s119_s25 = scalar_lea.hbm %s18_s17, 96  ;;  %s59_s28 = scalar_lea.hbm %s223_s3, %s142_s14 }
   0x7   : > { %s144_s29 = sshll.u32 %s174_s12, 6  ;;  %s179_s6 = smov [#allocation2 + $0x1]  }
   0x8   : > { %s40_s5 = scalar_lea.hbm %s222_s2, %s144_s29  ;;  %s180_s7 = smov [#allocation5]  }
   0x9   : > { %54 = dma.general %s113_s21, 64, %s40_s5, %s179_s6, %s180_s7, [#allocation6], %s178_s24, 0  }
   0xa   : > { %s181_s8 = smov [#allocation2 + $0x2]   ;;  %s182_s9 = smov [#allocation7]  }
   0xb   : > { %73 = dma.general %s119_s25, 32, %s59_s28, %s181_s8, %s182_s9, [#allocation8], %s178_s24, 0  }
   0xc   : > { %166 = dma.done.wait [#allocation2], 32 }
   0xd   : > { %167 = vsyncadd [#allocation2], 4294967264 }
   0xe   : > { %168 = dma.done.wait [#allocation2 + $0x1], 64 }
   0xf   : > { %169 = vsyncadd [#allocation2 + $0x1], 4294967232 }
  0x10   : > { %170 = dma.done.wait [#allocation2 + $0x2], 32 }
  0x11   : > { %171 = vsyncadd [#allocation2 + $0x2], 4294967264  ;;  %s14_s12 = sadd.s32 1, %s174_s12  }
  0x12   : > { %p11_p0 = scmp.ge.s32.totalorder %s14_s12, 2  }
  0x14   :  { %13 = sbr.rel (!%p11_p0) target bundleno = 1 (0x1), region = 29 }
  0x1b   :  { %86 = vsyncmov [#allocation2] }
  0x1e   :  { %s87_s10 = vpop.sfrf %86 }
  0x1f   :  { %p138_p1 = scmp.ne.s32.totalorder %s87_s10, 0 }
  0x21   :  { %91 = shalt.err (%p138_p1)  }
  0x22   :  { %93 = vsyncmov [#allocation2 + $0x1] }
  0x25   :  { %s94_s11 = vpop.sfrf %93 }
  0x26   :  { %p139_p2 = scmp.ne.s32.totalorder %s94_s11, 0 }
  0x28   :  { %98 = shalt.err (%p139_p2)  }
  0x29   :  { %100 = vsyncmov [#allocation2 + $0x2] }
  0x2c   :  { %s101_s13 = vpop.sfrf %100 }
  0x2d   :  { %p140_p3 = scmp.ne.s32.totalorder %s101_s13, 0 }
  0x2f   :  { %105 = shalt.err (%p140_p3)  }

</bundles_post_ra>
